<compile_context>
chip_gen: v6e
topology: v6e:2x2x1
jax: 0.10.0
libtpu: 0.0.40
codegen_flags: <defaults>
</compile_context>

<pallas_src>
import math

import jax
import jax.numpy as jnp
from jax.experimental import pallas as pl
from jax.experimental.pallas import tpu as pltpu  # noqa: F401  (TPU backend)


def _make_dup_kernel(apply_relu: bool):
    """Kernel: write [x, x] duplicated along a new middle axis (optionally relu'd).

    x_ref: (B, C*L) lane-dense input slab.
    o_ref: (B, 2, C*L) output; o[:, k, :] == (relu(x) if apply_relu else x).
    """

    def kernel(x_ref, o_ref):
        x = x_ref[...]
        if apply_relu:
            x = jnp.maximum(x, jnp.zeros_like(x))
        # Single full-block store — no sublane-offset partial stores.
        o_ref[...] = jnp.broadcast_to(x[:, None, :], o_ref.shape)

    return kernel


def model_forward(x: jax.Array) -> jax.Array:
    """Faithful forward of the PyTorch Model for inputs of rank >= 2."""
    B, C = x.shape[0], x.shape[1]
    rest = x.shape[2:]
    L = math.prod(rest) if rest else 1
    CL = C * L

    y_shape = (B, 2 * C) + rest
    # Static branch, identical to `y if y.shape != (2, 12) else z.relu()`
    # (shapes are static under tracing, just like PyTorch eager resolves them).
    apply_relu = (y_shape == (2, 12))

    # Lane-dense presentation: flatten everything after dim 0 into the last axis.
    x_flat = x.reshape(B, CL)

    itemsize = jnp.dtype(x.dtype).itemsize
    out = pl.pallas_call(
        _make_dup_kernel(apply_relu),
        out_shape=jax.ShapeDtypeStruct((B, 2, CL), x.dtype),
        in_specs=[pl.BlockSpec((B, CL), lambda: (0, 0))],
        out_specs=pl.BlockSpec((B, 2, CL), lambda: (0, 0, 0)),
        cost_estimate=pl.CostEstimate(
            flops=0,
            transcendentals=0,
            bytes_accessed=3 * B * CL * itemsize,  # read x + write 2 copies
        ),
    )(x_flat)

    if apply_relu:
        # z = y.view(B, -1).relu(); relu already applied in-kernel.
        return out.reshape(B, 2 * CL)
    # y = cat((x, x), dim=1): (B, 2, C, *rest) row-major == (B, 2*C, *rest).
    return out.reshape(y_shape)


if __name__ == "__main__":
    key = jax.random.PRNGKey(0)

    # Same shape as the PyTorch script: x = torch.randn(2, 3, 4)
    x = jax.random.normal(key, (2, 3, 4), dtype=jnp.float32)
    y = jax.block_until_ready(model_forward(x))

    # Reference: y.shape == (2, 6, 4) != (2, 12) -> return y (no relu).
    y_ref = jnp.concatenate((x, x), axis=1)
    assert y.shape == (2, 6, 4), y.shape
    assert jnp.allclose(y, y_ref), "mismatch vs reference (3-D path)"

    # Also exercise the relu branch of the module (2-D input -> y.shape == (2, 12)).
    x2 = jax.random.normal(jax.random.PRNGKey(1), (2, 6), dtype=jnp.float32)
    z = jax.block_until_ready(model_forward(x2))
    z_ref = jnp.maximum(jnp.concatenate((x2, x2), axis=1), 0.0)
    assert z.shape == (2, 12), z.shape
    assert jnp.allclose(z, z_ref), "mismatch vs reference (relu path)"

    print("KERNEL_OK")
</pallas_src>

<mosaic_0001>
module attributes {stable_mosaic.version = 11 : i64} {
  func.func @kernel(%arg0: memref<2x12xf32, #tpu.memory_space<vmem>>, %arg1: memref<2x2x12xf32, #tpu.memory_space<vmem>>) attributes {dimension_semantics = [], scalar_prefetch = 0 : i64, scratch_operands = 0 : i64, tpu.core_type = #tpu.core_type<tc>} {
    %c0 = arith.constant 0 : index
    %c0_0 = arith.constant 0 : index
    %0 = vector.load %arg0[%c0, %c0_0] : memref<2x12xf32, #tpu.memory_space<vmem>>, vector<2x12xf32>
    %1 = vector.shape_cast %0 : vector<2x12xf32> to vector<2x1x12xf32>
    %2 = vector.shape_cast %1 : vector<2x1x12xf32> to vector<2x1x12xf32>
    %3 = vector.broadcast %2 : vector<2x1x12xf32> to vector<2x2x12xf32>
    %c0_1 = arith.constant 0 : index
    %c0_2 = arith.constant 0 : index
    %c0_3 = arith.constant 0 : index
    %4 = vector.load %arg1[%c0_1, %c0_2, %c0_3] : memref<2x2x12xf32, #tpu.memory_space<vmem>>, vector<2x2x12xf32>
    tpu.vector_store %arg1[%c0_1, %c0_2, %c0_3], %3 {strides = array<i32>} : memref<2x2x12xf32, #tpu.memory_space<vmem>>, vector<2x2x12xf32>,
    return
  }
}

</mosaic_0001>

<bundles_post_ra>
// kernel: tpu_custom_call.1
= control target key start
LH: loop header
LB: loop body
LE: loop exit
PB: predicated region body
PF: predicated region fallthrough
CT: control target
= control target key end

     0   :  { %6 = vsyncpa [#allocation3], 0  ;;  %s146_s0 = inlined_call_operand.hbm [shape: f32[2,12], index: 0, kind: input, shape index: {}]   ;;  %s147_s1 = inlined_call_operand.hbm [shape: f32[2,2,12], index: 1, kind: output, shape index: {}]  }
   0x1   :  { %7 = vsyncpa [#allocation4], 0  ;;  %s125_s6 = smov [#allocation2]  }
   0x2   :  { %s14_s7 = sshll.u32 %s125_s6, 4  ;;  %s15_s7 = int_to_ptr.vmem [resolvable:$true] %s14_s7 }
   0x3   :  { %s89_s8 = scalar_lea.vmem %s15_s7, 32  ;;  %p94_p1 = scmp.lt.s32.totalorder %s15_s7, %s15_s7 }
   0x4   :  { %p90_p0 = scmp.ne.s32.totalorder %s15_s7, %s89_s8  ;;  %p95_p2 = scmp.lt.s32.totalorder %s89_s8, %s89_s8 }
   0x6   :  { %p96_p3 = por %p95_p2, %p94_p1 }
   0x8   :  { %p97_p4 = pnand %p96_p3, %p90_p0 }
   0xa   :  { %100 = shalt.err (!%p97_p4)
}
   0xb   :  { %17 = dma.hbm_to_vmem [thread:$0]  %s146_s0, 32, %s15_s7, [#allocation3]  }
   0xc   :  { %121 = dma.done.wait [#allocation3], 32  }
   0xd   :  { %122 = vsyncadd [#allocation3], 4294967264  ;;  %v34_v0 = vlaneseq  ;;  %v126_v1 = vmov 1966171168   ;;  %vm55_vm0 = vcmask 91136   ;;  %s127_s11 = smov [#allocation5]  }
   0xe   :  { %v32_v2 = vunpack.c.l.s4 %v126_v1  ;;  %v75_v7 = vld.sshfl [vmem:[#allocation2] sm:$0x11 pattern:$0x75316420]  ;;  %s63_s12 = sshll.u32 %s127_s11, 4  ;;  %s64_s12 = int_to_ptr.vmem [resolvable:$true] %s63_s12 }
   0xf   :  { %v35_v3 = vshrl.u32 %v34_v0, 7  ;;  %v30_v9 = vcombine.high %v75_v7, %v75_v7  ;;  %s101_s0 = scalar_lea.vmem %s64_s12, 64  ;;  %p106_p6 = scmp.lt.s32.totalorder %s64_s12, %s64_s12 }
  0x10   :  { %v33_v4 = vunpack.c.0.s8 %v32_v2  ;;  %p102_p5 = scmp.ne.s32.totalorder %s64_s12, %s101_s0  ;;  %p107_p7 = scmp.lt.s32.totalorder %s101_s0, %s101_s0 }
  0x11   :  { %v47_v6 = vsub.s32 0, %v35_v3 }
  0x12   :  { %v36_v5 = vsub.s32 %v33_v4, %v35_v3  ;;  %p108_p8 = por %p107_p7, %p106_p6 }
  0x14   :  { %v37_v8 = vrot.slane %v75_v7, %v36_v5  ;;  %v44_v11 = vrot.slane %v30_v9, %v36_v5  ;;  %p109_p9 = pnand %p108_p8, %p102_p5 }
  0x16   :  { %v48_v10 = vrot.slane %v37_v8, %v47_v6  ;;  %v52_v12 = vrot.slane %v44_v11, %v47_v6 }
  0x18   :  { %56 = vst.msk [vmem:[#allocation5] sm:$0x3] %vm55_vm0, %v48_v10  ;;  %57 = vst.msk [vmem:[#allocation5 + $0x2] sm:$0x3] %vm55_vm0, %v52_v12 }
  0x19   :  { %112 = shalt.err (!%p109_p9)
}
  0x1a   :  { %s128_s13 = smov 32   ;;  %s129_s14 = smov 2  }
  0x1b   :  { %69 = dma.vmem_to_hbm [thread:$0]  %s64_s12, 64, %s147_s1, [#allocation4], %s128_s13, %s128_s13, %s129_s14  }
  0x1c   :  { %123 = dma.done.wait [#allocation4], 64  }
  0x1d   :  { %124 = vsyncadd [#allocation4], 4294967232 }
  0x1e   :  { %73 = vsyncpa [#allocation3], 1 }
  0x1f   :  { %74 = vsyncpa [#allocation4], 1 }

</bundles_post_ra>
